<compile_context>
chip_gen: v5e
topology: v5e:2x2
jax: 0.10.0
libtpu: 0.0.40
codegen_flags: <defaults>
</compile_context>

<pallas_src>
import functools

import jax
import jax.numpy as jnp
from jax.experimental import pallas as pl
from jax.experimental.pallas import tpu as pltpu

LANE = 128


def _round_up(x, m):
    return ((x + m - 1) // m) * m


def _sublane_multiple(dtype):
    """Sublane packing multiple for a dtype (f32->8, bf16->16, int8->32)."""
    itemsize = jnp.dtype(dtype).itemsize
    if itemsize >= 4:
        return 8
    return (4 // itemsize) * 8


def _pow_gamma(q, gamma):
    """(q)**gamma, specialized to repeated multiplication for integer gamma."""
    g = float(gamma)
    if g == round(g) and 0.0 <= g <= 8.0:
        gi = int(round(g))
        if gi == 0:
            return jnp.ones_like(q)
        out = q
        for _ in range(gi - 1):
            out = out * q
        return out
    return jnp.power(q, g)


def _focal_elementwise(x, t, gamma, alpha, logits):
    """Elementwise focal loss term (float32 math)."""
    if logits:
        # Stable form of binary_cross_entropy_with_logits:
        #   bce = max(x,0) - x*t + log(1 + exp(-|x|))
        bce = jnp.maximum(x, 0.0) - x * t + jnp.log1p(jnp.exp(-jnp.abs(x)))
    else:
        # torch.F.binary_cross_entropy clamps the log terms at -100.
        log_p = jnp.maximum(jnp.log(x), -100.0)
        log_1mp = jnp.maximum(jnp.log(1.0 - x), -100.0)
        bce = -(t * log_p + (1.0 - t) * log_1mp)
    pt = jnp.exp(-bce)
    alpha_t = alpha * t + (1.0 - alpha) * (1.0 - t)
    return alpha_t * _pow_gamma(1.0 - pt, gamma) * bce


def _focal_reduce_kernel(pred_ref, target_ref, out_ref, acc_ref, *,
                         gamma, alpha, logits, scale, tail_valid, block_rows):
    i = pl.program_id(0)
    nblocks = pl.num_programs(0)

    @pl.when(i == 0)
    def _init():
        acc_ref[...] = jnp.zeros_like(acc_ref)

    x = pred_ref[...].astype(jnp.float32)
    t = target_ref[...].astype(jnp.float32)
    fl = _focal_elementwise(x, t, gamma, alpha, logits)

    block_elems = block_rows * LANE
    if tail_valid < block_elems:
        # Only the last grid step can contain padding / out-of-range rows, so
        # the mask (iota + compare + select) is only emitted on that branch.
        @pl.when(i < nblocks - 1)
        def _acc_full():
            acc_ref[...] += fl.reshape(block_rows // 8, 8, LANE).sum(axis=0)

        @pl.when(i == nblocks - 1)
        def _acc_masked():
            row_ids = jax.lax.broadcasted_iota(jnp.int32, (block_rows, LANE), 0)
            lane_ids = jax.lax.broadcasted_iota(jnp.int32, (block_rows, LANE), 1)
            local = row_ids * LANE + lane_ids           # block-local index (no overflow)
            flm = jnp.where(local < tail_valid, fl, 0.0)
            acc_ref[...] += flm.reshape(block_rows // 8, 8, LANE).sum(axis=0)
    else:
        acc_ref[...] += fl.reshape(block_rows // 8, 8, LANE).sum(axis=0)

    @pl.when(i == nblocks - 1)
    def _finalize():
        total = jnp.sum(acc_ref[...])                   # single XLU reduce at the end
        out_ref[...] = (total * scale).reshape(1, 1).astype(out_ref.dtype)


def _focal_map_kernel(pred_ref, target_ref, out_ref, *,
                      gamma, alpha, logits, loss_weight):
    x = pred_ref[...].astype(jnp.float32)
    t = target_ref[...].astype(jnp.float32)
    fl = _focal_elementwise(x, t, gamma, alpha, logits)
    out_ref[...] = (fl * loss_weight).astype(out_ref.dtype)


def _vmem_limit_bytes(block_rows, dtypes):
    per_step = sum(block_rows * LANE * jnp.dtype(d).itemsize for d in dtypes)
    needed = 2 * per_step + 8 * LANE * 4                # double-buffered + accumulator
    # Generous headroom; capped so it stays valid on v7x's 64 MiB VMEM.
    return int(min(48 * 2**20, max(16 * 2**20, 4 * needed)))


def binary_focal_loss(pred, target, *, gamma=2.0, alpha=0.5, logits=True,
                      reduce=True, loss_weight=1.0, block_rows=1024):
    """JAX/Pallas equivalent of BinaryFocalLoss.forward."""
    assert 0 < alpha < 1
    orig_shape = pred.shape
    n = int(pred.size)
    assert n > 0

    pred_f = pred.reshape(-1)
    targ_f = target.reshape(-1)

    rows = pl.cdiv(n, LANE)
    lane_pad = rows * LANE - n
    if lane_pad:
        # Only pad to the next multiple of 128 (needed for the lane-dense
        # reshape); zeros are safe for both loss variants and masked anyway.
        pred_f = jnp.pad(pred_f, (0, lane_pad))
        targ_f = jnp.pad(targ_f, (0, lane_pad))
    pred2 = pred_f.reshape(rows, LANE)
    targ2 = targ_f.reshape(rows, LANE)

    out_dtype = pred.dtype if jnp.issubdtype(pred.dtype, jnp.floating) else jnp.float32

    sub = max(_sublane_multiple(pred.dtype), _sublane_multiple(target.dtype),
              _sublane_multiple(out_dtype))
    block_rows_eff = min(_round_up(int(block_rows), sub), _round_up(rows, sub))

    num_blocks = pl.cdiv(rows, block_rows_eff)
    grid = (num_blocks,)
    block_elems = block_rows_eff * LANE
    tail_valid = n - (num_blocks - 1) * block_elems     # static Python int

    in_specs = [pl.BlockSpec((block_rows_eff, LANE), lambda i: (i, 0)),
                pl.BlockSpec((block_rows_eff, LANE), lambda i: (i, 0))]

    if reduce:
        kernel = functools.partial(
            _focal_reduce_kernel, gamma=float(gamma), alpha=float(alpha),
            logits=bool(logits), scale=float(loss_weight) / float(n),
            tail_valid=int(tail_valid), block_rows=block_rows_eff)
        out = pl.pallas_call(
            kernel,
            out_shape=jax.ShapeDtypeStruct((1, 1), jnp.float32),
            grid_spec=pltpu.PrefetchScalarGridSpec(
                num_scalar_prefetch=0,
                grid=grid,
                in_specs=in_specs,
                out_specs=pl.BlockSpec((1, 1), lambda i: (0, 0)),
                scratch_shapes=[pltpu.VMEM((8, LANE), jnp.float32)]),
            compiler_params=pltpu.CompilerParams(
                dimension_semantics=("arbitrary",),
                vmem_limit_bytes=_vmem_limit_bytes(
                    block_rows_eff, (pred.dtype, target.dtype))),
        )(pred2, targ2)
        return out[0, 0]
    else:
        kernel = functools.partial(
            _focal_map_kernel, gamma=float(gamma), alpha=float(alpha),
            logits=bool(logits), loss_weight=float(loss_weight))
        out = pl.pallas_call(
            kernel,
            out_shape=jax.ShapeDtypeStruct((rows, LANE), out_dtype),
            grid_spec=pltpu.PrefetchScalarGridSpec(
                num_scalar_prefetch=0,
                grid=grid,
                in_specs=in_specs,
                out_specs=pl.BlockSpec((block_rows_eff, LANE), lambda i: (i, 0)),
            ),
            compiler_params=pltpu.CompilerParams(
                dimension_semantics=("parallel",),
                vmem_limit_bytes=_vmem_limit_bytes(
                    block_rows_eff, (pred.dtype, target.dtype, out_dtype))),
        )(pred2, targ2)
        return out.reshape(-1)[:n].reshape(orig_shape)


def _reference(pred, target, gamma=2.0, alpha=0.5, logits=True, reduce=True,
               loss_weight=1.0):
    x = pred.astype(jnp.float32)
    t = target.astype(jnp.float32)
    if logits:
        bce = jnp.maximum(x, 0.0) - x * t + jnp.log1p(jnp.exp(-jnp.abs(x)))
    else:
        bce = -(t * jnp.maximum(jnp.log(x), -100.0)
                + (1 - t) * jnp.maximum(jnp.log(1 - x), -100.0))
    pt = jnp.exp(-bce)
    a = alpha * t + (1 - alpha) * (1 - t)
    fl = a * (1 - pt) ** gamma * bce
    if reduce:
        fl = jnp.mean(fl)
    return fl * loss_weight


if __name__ == "__main__":
    key = jax.random.PRNGKey(0)
    k1, k2, k3, k4 = jax.random.split(key, 4)

    # NCHW-like prediction logits (module is shape-agnostic).
    pred = jax.random.normal(k1, (2, 4, 16, 16), dtype=jnp.float32)
    target = (jax.random.uniform(k2, (2, 4, 16, 16)) > 0.5).astype(jnp.float32)

    # Default config: gamma=2.0, alpha=0.5, logits=True, reduce=True, loss_weight=1.0
    loss = jax.block_until_ready(binary_focal_loss(pred, target))
    ref = _reference(pred, target)
    assert jnp.allclose(loss, ref, rtol=1e-5, atol=1e-6), (loss, ref)

    # Elementwise (reduce=False) path.
    loss_map = jax.block_until_ready(binary_focal_loss(pred, target, reduce=False))
    ref_map = _reference(pred, target, reduce=False)
    assert loss_map.shape == pred.shape
    assert jnp.allclose(loss_map, ref_map, rtol=1e-5, atol=1e-6)

    # Size not a multiple of 128 -> exercises the gated tail mask.
    pred_odd = jax.random.normal(k3, (1000,), dtype=jnp.float32)
    targ_odd = (jax.random.uniform(k4, (1000,)) > 0.5).astype(jnp.float32)
    loss_odd = jax.block_until_ready(binary_focal_loss(pred_odd, targ_odd))
    ref_odd = _reference(pred_odd, targ_odd)
    assert jnp.allclose(loss_odd, ref_odd, rtol=1e-5, atol=1e-6), (loss_odd, ref_odd)

    # Probabilities path (logits=False) with a small tile -> multi-step accumulation.
    probs = jax.nn.sigmoid(pred)
    loss_p = jax.block_until_ready(
        binary_focal_loss(probs, target, logits=False, block_rows=8))
    ref_p = _reference(probs, target, logits=False)
    assert jnp.allclose(loss_p, ref_p, rtol=1e-5, atol=1e-6), (loss_p, ref_p)

    # bf16 inputs stay bf16 in HBM (no wrapper up-cast); math is f32 in-kernel.
    pred_bf = pred.astype(jnp.bfloat16)
    targ_bf = target.astype(jnp.bfloat16)
    loss_bf = jax.block_until_ready(binary_focal_loss(pred_bf, targ_bf))
    ref_bf = _reference(pred_bf, targ_bf)
    assert jnp.allclose(loss_bf, ref_bf, rtol=1e-4, atol=1e-5), (loss_bf, ref_bf)

    print("KERNEL_OK")
</pallas_src>

<mosaic_0001>
module attributes {stable_mosaic.version = 11 : i64} {
  func.func @_focal_reduce_kernel(%arg0: i32, %arg1: memref<16x128xf32, #tpu.memory_space<vmem>>, %arg2: memref<16x128xf32, #tpu.memory_space<vmem>>, %arg3: memref<1x1xf32, #tpu.memory_space<vmem>>, %arg4: memref<8x128xf32, #tpu.memory_space<vmem>>) attributes {dimension_semantics = [#tpu.dimension_semantics<arbitrary>], iteration_bounds = array<i64: 1>, scalar_prefetch = 0 : i64, scratch_operands = 1 : i64, tpu.core_type = #tpu.core_type<tc>, window_params = [{transform_indices = @transform_0, window_bounds = array<i64: 16, 128>}, {transform_indices = @transform_1, window_bounds = array<i64: 16, 128>}, {pipeline_mode = #tpu.pipeline_mode<synchronous>, transform_indices = @transform_2, window_bounds = array<i64: 1, 1>}]} {
    %c0_i32 = arith.constant 0 : i32
    %0 = arith.cmpi eq, %arg0, %c0_i32 : i32
    %1 = arith.extui %0 : i1 to i32
    %c0_i32_0 = arith.constant 0 : i32
    %2 = arith.cmpi ne, %1, %c0_i32_0 : i32
    scf.if %2 {
      %cst_17 = arith.constant 0.000000e+00 : f32
      %38 = vector.broadcast %cst_17 : f32 to vector<8x128xf32>
      %c0_18 = arith.constant 0 : index
      %c0_19 = arith.constant 0 : index
      %39 = vector.load %arg4[%c0_18, %c0_19] : memref<8x128xf32, #tpu.memory_space<vmem>>, vector<8x128xf32>
      tpu.vector_store %arg4[%c0_18, %c0_19], %38 {strides = array<i32>} : memref<8x128xf32, #tpu.memory_space<vmem>>, vector<8x128xf32>,
    } else {
    }
    %c0 = arith.constant 0 : index
    %c0_1 = arith.constant 0 : index
    %3 = vector.load %arg1[%c0, %c0_1] : memref<16x128xf32, #tpu.memory_space<vmem>>, vector<16x128xf32>
    %c0_2 = arith.constant 0 : index
    %c0_3 = arith.constant 0 : index
    %4 = vector.load %arg2[%c0_2, %c0_3] : memref<16x128xf32, #tpu.memory_space<vmem>>, vector<16x128xf32>
    %cst = arith.constant 0.000000e+00 : f32
    %5 = vector.broadcast %cst : f32 to vector<16x128xf32>
    %6 = arith.maximumf %3, %5 : vector<16x128xf32>
    %7 = arith.mulf %3, %4 : vector<16x128xf32>
    %8 = arith.subf %6, %7 : vector<16x128xf32>
    %9 = math.absf %3 : vector<16x128xf32>
    %cst_4 = arith.constant 0.000000e+00 : f32
    %10 = vector.broadcast %cst_4 : f32 to vector<16x128xf32>
    %11 = arith.subf %10, %9 : vector<16x128xf32>
    %12 = math.exp %11 : vector<16x128xf32>
    %13 = math.log1p %12 : vector<16x128xf32>
    %14 = arith.addf %8, %13 : vector<16x128xf32>
    %cst_5 = arith.constant 0.000000e+00 : f32
    %15 = vector.broadcast %cst_5 : f32 to vector<16x128xf32>
    %16 = arith.subf %15, %14 : vector<16x128xf32>
    %17 = math.exp %16 : vector<16x128xf32>
    %cst_6 = arith.constant 5.000000e-01 : f32
    %18 = vector.broadcast %cst_6 : f32 to vector<16x128xf32>
    %19 = arith.mulf %18, %4 : vector<16x128xf32>
    %cst_7 = arith.constant 1.000000e+00 : f32
    %20 = vector.broadcast %cst_7 : f32 to vector<16x128xf32>
    %21 = arith.subf %20, %4 : vector<16x128xf32>
    %cst_8 = arith.constant 5.000000e-01 : f32
    %22 = vector.broadcast %cst_8 : f32 to vector<16x128xf32>
    %23 = arith.mulf %22, %21 : vector<16x128xf32>
    %24 = arith.addf %19, %23 : vector<16x128xf32>
    %cst_9 = arith.constant 1.000000e+00 : f32
    %25 = vector.broadcast %cst_9 : f32 to vector<16x128xf32>
    %26 = arith.subf %25, %17 : vector<16x128xf32>
    %27 = arith.mulf %26, %26 : vector<16x128xf32>
    %28 = arith.mulf %24, %27 : vector<16x128xf32>
    %29 = arith.mulf %28, %14 : vector<16x128xf32>
    %c0_10 = arith.constant 0 : index
    %c0_11 = arith.constant 0 : index
    %30 = vector.load %arg4[%c0_10, %c0_11] : memref<8x128xf32, #tpu.memory_space<vmem>>, vector<8x128xf32>
    %31 = vector.shape_cast %29 : vector<16x128xf32> to vector<2x8x128xf32>
    %cst_12 = arith.constant dense<0.000000e+00> : vector<8x128xf32>
    %32 = vector.multi_reduction <add>, %31, %cst_12 [0] : vector<2x8x128xf32> to vector<8x128xf32>
    %33 = arith.addf %30, %32 : vector<8x128xf32>
    %c0_13 = arith.constant 0 : index
    %c0_14 = arith.constant 0 : index
    %34 = vector.load %arg4[%c0_13, %c0_14] : memref<8x128xf32, #tpu.memory_space<vmem>>, vector<8x128xf32>
    tpu.vector_store %arg4[%c0_13, %c0_14], %33 {strides = array<i32>} : memref<8x128xf32, #tpu.memory_space<vmem>>, vector<8x128xf32>,
    %c0_i32_15 = arith.constant 0 : i32
    %35 = arith.cmpi eq, %arg0, %c0_i32_15 : i32
    %36 = arith.extui %35 : i1 to i32
    %c0_i32_16 = arith.constant 0 : i32
    %37 = arith.cmpi ne, %36, %c0_i32_16 : i32
    scf.if %37 {
      %c0_17 = arith.constant 0 : index
      %c0_18 = arith.constant 0 : index
      %38 = vector.load %arg4[%c0_17, %c0_18] : memref<8x128xf32, #tpu.memory_space<vmem>>, vector<8x128xf32>
      %39 = vector.shape_cast %38 : vector<8x128xf32> to vector<1x8x128xf32>
      %cst_19 = arith.constant dense<0.000000e+00> : vector<1xf32>
      %40 = vector.multi_reduction <add>, %39, %cst_19 [1, 2] : vector<1x8x128xf32> to vector<1xf32>
      %41 = vector.shape_cast %40 : vector<1xf32> to vector<1x1x1xf32>
      %42 = vector.extract %41[0, 0, 0] : f32 from vector<1x1x1xf32>
      %cst_20 = arith.constant 4.8828125E-4 : f32
      %43 = arith.mulf %42, %cst_20 : f32
      %44 = vector.broadcast %43 : f32 to vector<1x1xf32>
      %c0_21 = arith.constant 0 : index
      %c0_22 = arith.constant 0 : index
      %45 = vector.load %arg3[%c0_21, %c0_22] : memref<1x1xf32, #tpu.memory_space<vmem>>, vector<1x1xf32>
      tpu.vector_store %arg3[%c0_21, %c0_22], %44 {strides = array<i32>} : memref<1x1xf32, #tpu.memory_space<vmem>>, vector<1x1xf32>,
    } else {
    }
    return
  }
  func.func @transform_0(%arg0: i32) -> (i32, i32) {
    %c0_i32 = arith.constant 0 : i32
    %c0_i32_0 = arith.constant 0 : i32
    return %arg0, %c0_i32 : i32, i32
  }
  func.func @transform_1(%arg0: i32) -> (i32, i32) {
    %c0_i32 = arith.constant 0 : i32
    %c0_i32_0 = arith.constant 0 : i32
    return %arg0, %c0_i32 : i32, i32
  }
  func.func @transform_2(%arg0: i32) -> (i32, i32) {
    %c0_i32 = arith.constant 0 : i32
    %c0_i32_0 = arith.constant 0 : i32
    %c0_i32_1 = arith.constant 0 : i32
    return %c0_i32, %c0_i32_0 : i32, i32
  }
}

</mosaic_0001>

<bundles_post_ra>
// kernel: tpu_custom_call.1
= control target key start
LH: loop header
LB: loop body
LE: loop exit
PB: predicated region body
PF: predicated region fallthrough
CT: control target
= control target key end

     0   :  { %7 = vsyncpa [#allocation4], 0  ;;  %s274_s0 = inlined_call_operand.hbm [shape: f32[16,128], index: 0, kind: input, shape index: {}]   ;;  %s275_s1 = inlined_call_operand.hbm [shape: f32[16,128], index: 1, kind: input, shape index: {}]   ;;  %s276_s2 = inlined_call_operand.hbm [shape: f32[1,1], index: 2, kind: output, shape index: {}]  }
   0x1   :  { %8 = vsyncpa [#allocation7], 0 }
   0x2   :  { %9 = vsyncpa [#allocation5], 0  ;;  %s14_s11 = sshll.u32 %s274_s0, 4  ;;  %s245_s12 = smov [#allocation3]   ;;  %s15_s11 = int_to_ptr.hbm [resolvable:$true] %s14_s11 }
   0x3   :  { %s16_s13 = sshll.u32 %s245_s12, 4  ;;  %s27_s16 = sshll.u32 %s275_s1, 4  ;;  %s17_s13 = int_to_ptr.vmem [resolvable:$true] %s16_s13  ;;  %s28_s16 = int_to_ptr.hbm [resolvable:$true] %s27_s16 }
   0x4   :  { %s246_s17 = smov 128   ;;  %s247_s18 = smov 8  }
   0x5   :  { %22 = dma.hbm_to_vmem [thread:$0]  %s15_s11, 256, %s17_s13, [#allocation4], %s246_s17, %s246_s17, %s247_s18  }
   0x6   :  { %s248_s19 = smov [#allocation6]  }
   0x7   :  { %s29_s20 = sshll.u32 %s248_s19, 4  ;;  %s30_s20 = int_to_ptr.vmem [resolvable:$true] %s29_s20 }
   0x8   :  { %35 = dma.hbm_to_vmem [thread:$0]  %s28_s16, 256, %s30_s20, [#allocation7], %s246_s17, %s246_s17, %s247_s18  }
   0x9   :  { %239 = dma.done.wait [#allocation4], 256  }
   0xa   :  { %240 = vsyncadd [#allocation4], 4294967040 }
   0xb   :  { %241 = dma.done.wait [#allocation7], 256  }
   0xc   :  { %242 = vsyncadd [#allocation7], 4294967040  ;;  %v49_v0 = vld [vmem:[#allocation3] sm:$0xff]  ;;  %v50_v1 = vld [vmem:[#allocation3 + $0x8] sm:$0xff]  ;;  %s249_s0 = smov [#allocation8]   ;;  %s137_s23 = sshll.u32 %s276_s2, 4  ;;  %s138_s23 = int_to_ptr.hbm [resolvable:$true] %s137_s23 }
   0xd   :  { %v59_v2 = vand.u32 2147483647, %v49_v0  ;;  %v60_v3 = vand.u32 2147483647, %v50_v1  ;;  %v51_v12 = vld [vmem:[#allocation6] sm:$0xff]  ;;  %v52_v15 = vld [vmem:[#allocation6 + $0x8] sm:$0xff] }
   0xe   :  { %v53_v17 = vmax.f32 %v49_v0, 0.0  ;;  %v55_v18 = vmul.f32 %v51_v12, %v49_v0  ;;  %v54_v21 = vmax.f32 %v50_v1, 0.0  ;;  %v56_v22 = vmul.f32 %v52_v15, %v50_v1  ;;  %s135_s1 = sshll.u32 %s249_s0, 4  ;;  %s136_s1 = int_to_ptr.vmem [resolvable:$true] %s135_s1 }
   0xf   :  { %v61_v4 = vsub.f32 0.0, %v59_v2  ;;  %v62_v5 = vsub.f32 0.0, %v60_v3  ;;  %v95_v40 = vsub.f32 1.0, %v51_v12  ;;  %v96_v41 = vsub.f32 1.0, %v52_v15 }
  0x10   :  { %v57_v26 = vsub.f32 %v53_v17, %v55_v18  ;;  %v58_v29 = vsub.f32 %v54_v21, %v56_v22  ;;  %v93_v42 = vmul.f32 0.5, %v51_v12  ;;  %v94_v44 = vmul.f32 0.5, %v52_v15 }
  0x11   :  { %v63_v6 = vmul.f32 1.442695, %v61_v4  ;;  %v65_v7 = vmul.f32 1.442695, %v62_v5  ;;  %v97_v43 = vmul.f32 0.5, %v95_v40  ;;  %v98_v45 = vmul.f32 0.5, %v96_v41 }
  0x12   :  { %vm128_vm2 = vcmask 0  }
  0x13   :  { %155 = vpow2.f32 %v63_v6  ;;  %v99_v48 = vadd.f32 %v97_v43, %v93_v42  ;;  %v100_v50 = vadd.f32 %v98_v45, %v94_v44 }
  0x14   :  { %157 = vpow2.f32 %v65_v7 }
  0x19   :  { %v156_v8 = vpop.eup %155 }
  0x1a   :  { %v158_v9 = vpop.eup %157  ;;  %v67_v10 = vadd.f32 1.0, %v156_v8  ;;  %v70_v11 = vmul.f32 -0.5, %v156_v8  ;;  %v73_v19 = vand.u32 2147483647, %v156_v8 }
  0x1b   :  { %v76_v13 = vadd.f32 1.0, %v158_v9  ;;  %v79_v14 = vmul.f32 -0.5, %v158_v9  ;;  %v82_v23 = vand.u32 2147483647, %v158_v9 }
  0x1c   :  { %159 = vlog2.f32 %v67_v10  ;;  %v71_v16 = vadd.f32 1.0, %v70_v11  ;;  %vm74_vm0 = vcmp.lt.f32.partialorder %v73_v19, 0.0004427343 }
  0x1d   :  { %161 = vlog2.f32 %v76_v13  ;;  %v80_v20 = vadd.f32 1.0, %v79_v14  ;;  %vm83_vm1 = vcmp.lt.f32.partialorder %v82_v23, 0.0004427343 }
  0x1e   :  { %v72_v24 = vmul.f32 %v156_v8, %v71_v16 }
  0x1f   :  { %v81_v27 = vmul.f32 %v158_v9, %v80_v20 }
  0x22   :  { %v160_v25 = vpop.eup %159 }
  0x23   :  { %v162_v28 = vpop.eup %161  ;;  %v69_v30 = vmul.f32 0.6931472, %v160_v25 }
  0x24   :  { %v78_v31 = vmul.f32 0.6931472, %v162_v28 }
  0x25   :  { %v75_v32 = vsel %vm74_vm0, %v72_v24, %v69_v30 }
  0x26   :  { %v84_v33 = vsel %vm83_vm1, %v81_v27, %v78_v31  ;;  %v85_v34 = vadd.f32 %v75_v32, %v57_v26 }
  0x27   :  { %v86_v35 = vadd.f32 %v84_v33, %v58_v29 }
  0x28   :  { %v87_v36 = vsub.f32 0.0, %v85_v34 }
  0x29   :  { %v88_v37 = vsub.f32 0.0, %v86_v35 }
  0x2a   :  { %v89_v38 = vmul.f32 1.442695, %v87_v36 }
  0x2b   :  { %v91_v39 = vmul.f32 1.442695, %v88_v37 }
  0x2c   :  { %163 = vpow2.f32 %v89_v38 }
  0x2d   :  { %165 = vpow2.f32 %v91_v39 }
  0x32   :  { %v164_v46 = vpop.eup %163 }
  0x33   :  { %v166_v47 = vpop.eup %165  ;;  %v101_v49 = vsub.f32 1.0, %v164_v46 }
  0x34   :  { %v102_v51 = vsub.f32 1.0, %v166_v47 }
  0x35   :  { %v103_v52 = vmul.f32 %v101_v49, %v101_v49 }
  0x36   :  { %v104_v53 = vmul.f32 %v102_v51, %v102_v51 }
  0x37   :  { %v105_v54 = vmul.f32 %v103_v52, %v99_v48 }
  0x38   :  { %v106_v55 = vmul.f32 %v104_v53, %v100_v50 }
  0x39   :  { %v107_v56 = vmul.f32 %v105_v54, %v85_v34 }
  0x3a   :  { %v108_v57 = vmul.f32 %v106_v55, %v86_v35 }
  0x3c   :  { %v110_v58 = vadd.f32 %v108_v57, %v107_v56 }
  0x3e   :  { %117 = vadd.xlane.f32.xlu0 %v110_v58 }
  0xb1   :  { %v118_v59 = vpop.xlane.xlu0 %117 }
  0xb2   :  { %v119_v60 = vrot.slane %v118_v59, 4 }
  0xb4   :  { %v120_v61 = vadd.f32 %v119_v60, %v118_v59 }
  0xb6   :  { %v121_v62 = vrot.slane %v120_v61, 2 }
  0xb8   :  { %v122_v63 = vadd.f32 %v121_v62, %v120_v61 }
  0xba   :  { %v123_v0 = vrot.slane %v122_v63, 1 }
  0xbc   :  { %v124_v1 = vadd.f32 %v123_v0, %v122_v63 }
  0xbe   :  { %148 = vpush %v124_v1 }
  0xef   :  { %s149_s24 = spop %148 }
  0xf0   :  { %s126_s25 = smul.f32 0.00048828125, %s149_s24 }
  0xf2   :  { %v127_v2 = vstv %s126_s25 }
  0xf3   :  { %129 = vst.msk [vmem:[#allocation8] sm:$0x1] %vm128_vm2, %v127_v2 }
  0xf4   :  { %140 = dma.vmem_to_hbm [thread:$0]  %s136_s1, 16, %s138_s23, [#allocation5]  }
  0xf5   :  { %243 = dma.done.wait [#allocation5], 16  }
  0xf6   :  { %244 = vsyncadd [#allocation5], 4294967280 }
  0xf7   :  { %145 = vsyncpa [#allocation4], 1 }
  0xf8   :  { %146 = vsyncpa [#allocation7], 1 }
  0xf9   :  { %147 = vsyncpa [#allocation5], 1 }

</bundles_post_ra>
